<compile_context>
chip_gen: v5e
topology: v5e:2x2
jax: 0.10.0
libtpu: 0.0.40
codegen_flags: <defaults>
</compile_context>

<pallas_src>
import jax
import jax.numpy as jnp
from jax.experimental import pallas as pl
from jax.experimental.pallas import tpu as pltpu

LANE = 128


def _cdiv(a, b):
    return -(-a // b)


def _round_up(x, m):
    return ((x + m - 1) // m) * m


def _round_down(x, m):
    return (x // m) * m


def _largest_divisor_leq(n, cap):
    for d in range(min(n, cap), 0, -1):
        if n % d == 0:
            return d
    return 1


def _sublane_multiple(dtype):
    itemsize = jnp.dtype(dtype).itemsize
    if itemsize >= 4:
        return 8
    if itemsize == 2:
        return 16
    return 32


def _vmem_capacity_bytes():
    # Generation-aware VMEM budget (64 MiB on v7x, 128 MiB on v5e/v6e).
    try:
        cap = getattr(pltpu.get_tpu_info(), "vmem_capacity_bytes", None)
        if cap:
            return int(cap)
    except Exception:
        pass
    return 64 * 1024 * 1024  # conservative fallback (v7x per-TC VMEM)


def _make_kernel(f, K, TK, NK, NKS, has_tail, may_skip):
    """All shape params are Python ints; f is an elementwise jnp-traceable fn."""

    def kernel(inp_ref, tgt_ref, gt_ref, o_d2, o_gd2, o_ga2, o_g):
        s = pl.program_id(0)   # reduction-split index ("parallel")
        j = pl.program_id(2)   # K-tile step within this split ("arbitrary")

        @pl.when(j == 0)
        def _init():
            o_d2[...] = jnp.zeros_like(o_d2)
            o_gd2[...] = jnp.zeros_like(o_gd2)
            o_ga2[...] = jnp.zeros_like(o_ga2)
            o_g[...] = jnp.zeros_like(o_g)

        t_idx = s * NKS + j    # global K-tile index handled by this step

        def accumulate(mask_tail):
            # Native-dtype tiles widened to f32 in VMEM (keeps math in f32).
            x = inp_ref[...].astype(jnp.float32)   # (TB, TK, LANE)
            t = tgt_ref[...].astype(jnp.float32)
            g = gt_ref[...].astype(jnp.float32)
            if mask_tail:
                # Ragged last tile: zero the sublane-rows past the true K.
                row = jax.lax.broadcasted_iota(jnp.int32, (TK, LANE), 0)
                valid = (t_idx * TK + row) < K
                x = jnp.where(valid[None], x, 0.0)
                t = jnp.where(valid[None], t, 0.0)
                g = jnp.where(valid[None], g, 0.0)
            d = x - t
            d2 = d * d
            a = f(t) - x
            a2 = a * a
            # Lane-wide partial sums: reduce only the sublane (TK) axis and
            # accumulate into the resident (1, TB, LANE) output blocks.
            o_d2[...] += jnp.sum(d2, axis=1)[None]
            o_gd2[...] += jnp.sum(g * d2, axis=1)[None]
            o_ga2[...] += jnp.sum(g * a2, axis=1)[None]
            o_g[...] += jnp.sum(g, axis=1)[None]

        if not has_tail and not may_skip:
            accumulate(False)            # common fast path, no masking at all
        else:
            in_range = t_idx < NK
            if has_tail:
                is_tail = t_idx == NK - 1

                @pl.when(in_range & jnp.logical_not(is_tail))
                def _full():
                    accumulate(False)

                @pl.when(is_tail)
                def _tail():
                    accumulate(True)
            else:
                @pl.when(in_range)
                def _full():
                    accumulate(False)

    return kernel


def make_aaexad_loss(lambda_u, lambda_n, lambda_a, f):
    """Returns (input, target, gt, y) -> scalar loss (lambda_p=None branch)."""
    lambda_u = float(lambda_u)
    lambda_n = float(lambda_n)
    lambda_a = float(lambda_a)
    vmem_cap = _vmem_capacity_bytes()

    @jax.jit
    def loss_fn(inp, tgt, gt, y):
        B = inp.shape[0]
        P = 1
        for d in inp.shape[1:]:
            P *= d
        npix = float(P)  # Npix of the true (unpadded) image, as in PyTorch.

        # ---- geometry: view each sample as (K, 128) lane-major slabs -------
        P_pad = _round_up(P, LANE)
        K = P_pad // LANE

        def to_bkl(a):
            a = a.reshape(B, P)
            if P_pad != P:
                # Zero padding is exactly neutral for all four partial sums;
                # only hit when C*H*W is not a multiple of 128.
                a = jnp.pad(a, ((0, 0), (0, P_pad - P)))
            return a.reshape(B, K, LANE)

        inp3, tgt3, gt3 = to_bkl(inp), to_bkl(tgt), to_bkl(gt)

        # ---- tile sizing (generation aware, no batch padding ever) ---------
        sub = max(_sublane_multiple(inp.dtype), _sublane_multiple(tgt.dtype),
                  _sublane_multiple(gt.dtype))
        bytes_per_elem = (jnp.dtype(inp.dtype).itemsize
                          + jnp.dtype(tgt.dtype).itemsize
                          + jnp.dtype(gt.dtype).itemsize)
        # Keep 3 double-buffered input streams within ~1/3 of physical VMEM
        # (<= 24 MiB): ~4 MiB per f32 tile on v7x, slightly more on v5e/v6e.
        tile_budget = min(vmem_cap // 3, 24 * 1024 * 1024)
        max_rows = max(sub, tile_budget // (2 * bytes_per_elem * LANE))

        TB = _largest_divisor_leq(B, 8)      # divides B exactly -> no B pad
        NB = B // TB
        TK = min(K, max(sub, _round_down(max_rows // TB, sub)))
        NK = _cdiv(K, TK)
        if NK > 1:
            # Re-balance so the last tile is not pathologically small.
            TK = min(K, _round_up(_cdiv(K, NK), sub))
            NK = _cdiv(K, TK)
        NSPLIT = 2 if NK >= 2 else 1         # 2-way reduction split (v7x TCs)
        NKS = _cdiv(NK, NSPLIT)
        has_tail = (K % TK) != 0
        may_skip = NSPLIT * NKS > NK

        if may_skip:
            def in_map(s, bi, j):
                # Clamp so out-of-range steps (skipped in-kernel) never DMA OOB.
                return (bi, jnp.minimum(s * NKS + j, NK - 1), 0)
        else:
            def in_map(s, bi, j):
                return (bi, s * NKS + j, 0)

        def out_map(s, bi, j):
            return (s * NB + bi, 0, 0)

        kernel = _make_kernel(f, K, TK, NK, NKS, has_tail, may_skip)
        out_struct = jax.ShapeDtypeStruct((NSPLIT * NB, TB, LANE), jnp.float32)

        outs = pl.pallas_call(
            kernel,
            out_shape=[out_struct] * 4,      # sum d2, sum g*d2, sum g*a2, sum g
            grid_spec=pltpu.PrefetchScalarGridSpec(
                num_scalar_prefetch=0,
                grid=(NSPLIT, NB, NKS),
                in_specs=[pl.BlockSpec((TB, TK, LANE), in_map)
                          for _ in range(3)],
                out_specs=[pl.BlockSpec((1, TB, LANE), out_map)
                           for _ in range(4)],
            ),
            compiler_params=pltpu.CompilerParams(
                dimension_semantics=("parallel", "parallel", "arbitrary"),
                vmem_limit_bytes=min(48 * 1024 * 1024, (3 * vmem_cap) // 4),
            ),
        )(inp3, tgt3, gt3)

        # ---- tiny O(B*128) epilogue in the wrapper --------------------------
        s_d2, s_gd2, s_ga2, s_g = (
            o.reshape(NSPLIT, NB, TB, LANE).sum(axis=(0, 3)).reshape(B)
            for o in outs)

        # lambda_p scalar = Npix / sum(gt); 0 when the mask is empty (matches
        # PyTorch: where(gt==1, inf, gt) never selects inf for an empty mask).
        lam = jnp.where(s_g > 0.0, npix / jnp.where(s_g > 0.0, s_g, 1.0), 0.0)
        anom = (s_d2 - s_gd2) + lam * s_ga2

        yv = y.reshape(B)
        w_rec = (lambda_u * (yv == 0).astype(jnp.float32)
                 + lambda_n * (yv == 1).astype(jnp.float32))
        w_anom = lambda_a * (yv == -1).astype(jnp.float32)
        return jnp.sum(w_rec * s_d2 + w_anom * anom)

    return loss_fn


def _reference_loss(inp, tgt, gt, y, lambda_u, lambda_n, lambda_a, f):
    """Pure-JAX reference mirroring the PyTorch forward (lambda_p=None)."""
    d2 = jnp.sum((inp - tgt) ** 2, axis=(1, 2, 3))
    rec_u = jnp.where(y == 0, d2, 0.0)
    rec_n = jnp.where(y == 1, d2, 0.0)
    npix = float(gt.shape[1] * gt.shape[2] * gt.shape[3])
    lam_p = npix / jnp.sum(gt, axis=(1, 2, 3))
    lam_p = jnp.broadcast_to(lam_p[:, None, None, None], gt.shape)
    lam_p = jnp.where(gt == 1, lam_p, gt)
    rec_a = jnp.where(
        y == -1,
        jnp.sum((1 - gt) * (inp - tgt) ** 2 + lam_p * gt * (f(tgt) - inp) ** 2,
                axis=(1, 2, 3)),
        0.0)
    return jnp.sum(lambda_u * rec_u + lambda_n * rec_n + lambda_a * rec_a)


if __name__ == "__main__":
    B, C, H, W = 2, 4, 16, 16
    key = jax.random.PRNGKey(0)
    k1, k2, k3 = jax.random.split(key, 3)

    inp = jax.random.normal(k1, (B, C, H, W), dtype=jnp.float32)
    tgt = jax.random.normal(k2, (B, C, H, W), dtype=jnp.float32)
    # Binary anomaly mask; bf16 is exact for {0,1} and halves its HBM traffic.
    gt = (jax.random.uniform(k3, (B, C, H, W)) < 0.2).astype(jnp.bfloat16)
    # One normal sample, one anomalous sample (labels in {-1, 0, 1}).
    y = jnp.array([1, -1], dtype=jnp.int32)

    lambda_u, lambda_n, lambda_a = 1.0, 1.0, 1.0
    f = lambda t: 1.0 - t  # deterministic choice for the module's `f`

    loss_fn = make_aaexad_loss(lambda_u, lambda_n, lambda_a, f)
    loss = jax.block_until_ready(loss_fn(inp, tgt, gt, y))

    ref = jax.block_until_ready(
        _reference_loss(inp, tgt, gt.astype(jnp.float32), y,
                        lambda_u, lambda_n, lambda_a, f))

    assert jnp.allclose(loss, ref, rtol=1e-4, atol=1e-3), (loss, ref)
    print("KERNEL_OK")
</pallas_src>

<mosaic_0001>
module attributes {stable_mosaic.version = 11 : i64} {
  func.func @kernel(%arg0: i32, %arg1: i32, %arg2: i32, %arg3: memref<2x8x128xf32, #tpu.memory_space<vmem>>, %arg4: memref<2x8x128xf32, #tpu.memory_space<vmem>>, %arg5: memref<2x8x128xbf16, #tpu.memory_space<vmem>>, %arg6: memref<1x2x128xf32, #tpu.memory_space<vmem>>, %arg7: memref<1x2x128xf32, #tpu.memory_space<vmem>>, %arg8: memref<1x2x128xf32, #tpu.memory_space<vmem>>, %arg9: memref<1x2x128xf32, #tpu.memory_space<vmem>>) attributes {dimension_semantics = [#tpu.dimension_semantics<parallel>, #tpu.dimension_semantics<parallel>, #tpu.dimension_semantics<arbitrary>], iteration_bounds = array<i64: 1, 1, 1>, scalar_prefetch = 0 : i64, scratch_operands = 0 : i64, tpu.core_type = #tpu.core_type<tc>, window_params = [{transform_indices = @transform_0, window_bounds = array<i64: 2, 8, 128>}, {transform_indices = @transform_1, window_bounds = array<i64: 2, 8, 128>}, {transform_indices = @transform_2, window_bounds = array<i64: 2, 8, 128>}, {transform_indices = @transform_3, window_bounds = array<i64: 1, 2, 128>}, {transform_indices = @transform_4, window_bounds = array<i64: 1, 2, 128>}, {transform_indices = @transform_5, window_bounds = array<i64: 1, 2, 128>}, {transform_indices = @transform_6, window_bounds = array<i64: 1, 2, 128>}]} {
    %c0_i32 = arith.constant 0 : i32
    %0 = arith.cmpi eq, %arg2, %c0_i32 : i32
    %1 = arith.extui %0 : i1 to i32
    %c0_i32_0 = arith.constant 0 : i32
    %2 = arith.cmpi ne, %1, %c0_i32_0 : i32
    scf.if %2 {
      %cst_37 = arith.constant 0.000000e+00 : f32
      %35 = vector.broadcast %cst_37 : f32 to vector<1x2x128xf32>
      %c0_38 = arith.constant 0 : index
      %c0_39 = arith.constant 0 : index
      %c0_40 = arith.constant 0 : index
      %36 = vector.load %arg6[%c0_38, %c0_39, %c0_40] : memref<1x2x128xf32, #tpu.memory_space<vmem>>, vector<1x2x128xf32>
      tpu.vector_store %arg6[%c0_38, %c0_39, %c0_40], %35 {strides = array<i32>} : memref<1x2x128xf32, #tpu.memory_space<vmem>>, vector<1x2x128xf32>,
      %cst_41 = arith.constant 0.000000e+00 : f32
      %37 = vector.broadcast %cst_41 : f32 to vector<1x2x128xf32>
      %c0_42 = arith.constant 0 : index
      %c0_43 = arith.constant 0 : index
      %c0_44 = arith.constant 0 : index
      %38 = vector.load %arg7[%c0_42, %c0_43, %c0_44] : memref<1x2x128xf32, #tpu.memory_space<vmem>>, vector<1x2x128xf32>
      tpu.vector_store %arg7[%c0_42, %c0_43, %c0_44], %37 {strides = array<i32>} : memref<1x2x128xf32, #tpu.memory_space<vmem>>, vector<1x2x128xf32>,
      %cst_45 = arith.constant 0.000000e+00 : f32
      %39 = vector.broadcast %cst_45 : f32 to vector<1x2x128xf32>
      %c0_46 = arith.constant 0 : index
      %c0_47 = arith.constant 0 : index
      %c0_48 = arith.constant 0 : index
      %40 = vector.load %arg8[%c0_46, %c0_47, %c0_48] : memref<1x2x128xf32, #tpu.memory_space<vmem>>, vector<1x2x128xf32>
      tpu.vector_store %arg8[%c0_46, %c0_47, %c0_48], %39 {strides = array<i32>} : memref<1x2x128xf32, #tpu.memory_space<vmem>>, vector<1x2x128xf32>,
      %cst_49 = arith.constant 0.000000e+00 : f32
      %41 = vector.broadcast %cst_49 : f32 to vector<1x2x128xf32>
      %c0_50 = arith.constant 0 : index
      %c0_51 = arith.constant 0 : index
      %c0_52 = arith.constant 0 : index
      %42 = vector.load %arg9[%c0_50, %c0_51, %c0_52] : memref<1x2x128xf32, #tpu.memory_space<vmem>>, vector<1x2x128xf32>
      tpu.vector_store %arg9[%c0_50, %c0_51, %c0_52], %41 {strides = array<i32>} : memref<1x2x128xf32, #tpu.memory_space<vmem>>, vector<1x2x128xf32>,
    } else {
    }
    %c0 = arith.constant 0 : index
    %c0_1 = arith.constant 0 : index
    %c0_2 = arith.constant 0 : index
    %3 = vector.load %arg3[%c0, %c0_1, %c0_2] : memref<2x8x128xf32, #tpu.memory_space<vmem>>, vector<2x8x128xf32>
    %c0_3 = arith.constant 0 : index
    %c0_4 = arith.constant 0 : index
    %c0_5 = arith.constant 0 : index
    %4 = vector.load %arg4[%c0_3, %c0_4, %c0_5] : memref<2x8x128xf32, #tpu.memory_space<vmem>>, vector<2x8x128xf32>
    %c0_6 = arith.constant 0 : index
    %c0_7 = arith.constant 0 : index
    %c0_8 = arith.constant 0 : index
    %5 = vector.load %arg5[%c0_6, %c0_7, %c0_8] : memref<2x8x128xbf16, #tpu.memory_space<vmem>>, vector<2x8x128xbf16>
    %6 = arith.extf %5 : vector<2x8x128xbf16> to vector<2x8x128xf32>
    %7 = arith.subf %3, %4 : vector<2x8x128xf32>
    %8 = arith.mulf %7, %7 : vector<2x8x128xf32>
    %cst = arith.constant 1.000000e+00 : f32
    %9 = vector.broadcast %cst : f32 to vector<2x8x128xf32>
    %10 = arith.subf %9, %4 : vector<2x8x128xf32>
    %11 = arith.subf %10, %3 : vector<2x8x128xf32>
    %12 = arith.mulf %11, %11 : vector<2x8x128xf32>
    %c0_9 = arith.constant 0 : index
    %c0_10 = arith.constant 0 : index
    %c0_11 = arith.constant 0 : index
    %13 = vector.load %arg6[%c0_9, %c0_10, %c0_11] : memref<1x2x128xf32, #tpu.memory_space<vmem>>, vector<1x2x128xf32>
    %cst_12 = arith.constant dense<0.000000e+00> : vector<2x128xf32>
    %14 = vector.multi_reduction <add>, %8, %cst_12 [1] : vector<2x8x128xf32> to vector<2x128xf32>
    %15 = vector.shape_cast %14 : vector<2x128xf32> to vector<1x2x128xf32>
    %16 = arith.addf %13, %15 : vector<1x2x128xf32>
    %c0_13 = arith.constant 0 : index
    %c0_14 = arith.constant 0 : index
    %c0_15 = arith.constant 0 : index
    %17 = vector.load %arg6[%c0_13, %c0_14, %c0_15] : memref<1x2x128xf32, #tpu.memory_space<vmem>>, vector<1x2x128xf32>
    tpu.vector_store %arg6[%c0_13, %c0_14, %c0_15], %16 {strides = array<i32>} : memref<1x2x128xf32, #tpu.memory_space<vmem>>, vector<1x2x128xf32>,
    %c0_16 = arith.constant 0 : index
    %c0_17 = arith.constant 0 : index
    %c0_18 = arith.constant 0 : index
    %18 = vector.load %arg7[%c0_16, %c0_17, %c0_18] : memref<1x2x128xf32, #tpu.memory_space<vmem>>, vector<1x2x128xf32>
    %19 = arith.mulf %6, %8 : vector<2x8x128xf32>
    %cst_19 = arith.constant dense<0.000000e+00> : vector<2x128xf32>
    %20 = vector.multi_reduction <add>, %19, %cst_19 [1] : vector<2x8x128xf32> to vector<2x128xf32>
    %21 = vector.shape_cast %20 : vector<2x128xf32> to vector<1x2x128xf32>
    %22 = arith.addf %18, %21 : vector<1x2x128xf32>
    %c0_20 = arith.constant 0 : index
    %c0_21 = arith.constant 0 : index
    %c0_22 = arith.constant 0 : index
    %23 = vector.load %arg7[%c0_20, %c0_21, %c0_22] : memref<1x2x128xf32, #tpu.memory_space<vmem>>, vector<1x2x128xf32>
    tpu.vector_store %arg7[%c0_20, %c0_21, %c0_22], %22 {strides = array<i32>} : memref<1x2x128xf32, #tpu.memory_space<vmem>>, vector<1x2x128xf32>,
    %c0_23 = arith.constant 0 : index
    %c0_24 = arith.constant 0 : index
    %c0_25 = arith.constant 0 : index
    %24 = vector.load %arg8[%c0_23, %c0_24, %c0_25] : memref<1x2x128xf32, #tpu.memory_space<vmem>>, vector<1x2x128xf32>
    %25 = arith.mulf %6, %12 : vector<2x8x128xf32>
    %cst_26 = arith.constant dense<0.000000e+00> : vector<2x128xf32>
    %26 = vector.multi_reduction <add>, %25, %cst_26 [1] : vector<2x8x128xf32> to vector<2x128xf32>
    %27 = vector.shape_cast %26 : vector<2x128xf32> to vector<1x2x128xf32>
    %28 = arith.addf %24, %27 : vector<1x2x128xf32>
    %c0_27 = arith.constant 0 : index
    %c0_28 = arith.constant 0 : index
    %c0_29 = arith.constant 0 : index
    %29 = vector.load %arg8[%c0_27, %c0_28, %c0_29] : memref<1x2x128xf32, #tpu.memory_space<vmem>>, vector<1x2x128xf32>
    tpu.vector_store %arg8[%c0_27, %c0_28, %c0_29], %28 {strides = array<i32>} : memref<1x2x128xf32, #tpu.memory_space<vmem>>, vector<1x2x128xf32>,
    %c0_30 = arith.constant 0 : index
    %c0_31 = arith.constant 0 : index
    %c0_32 = arith.constant 0 : index
    %30 = vector.load %arg9[%c0_30, %c0_31, %c0_32] : memref<1x2x128xf32, #tpu.memory_space<vmem>>, vector<1x2x128xf32>
    %cst_33 = arith.constant dense<0.000000e+00> : vector<2x128xf32>
    %31 = vector.multi_reduction <add>, %6, %cst_33 [1] : vector<2x8x128xf32> to vector<2x128xf32>
    %32 = vector.shape_cast %31 : vector<2x128xf32> to vector<1x2x128xf32>
    %33 = arith.addf %30, %32 : vector<1x2x128xf32>
    %c0_34 = arith.constant 0 : index
    %c0_35 = arith.constant 0 : index
    %c0_36 = arith.constant 0 : index
    %34 = vector.load %arg9[%c0_34, %c0_35, %c0_36] : memref<1x2x128xf32, #tpu.memory_space<vmem>>, vector<1x2x128xf32>
    tpu.vector_store %arg9[%c0_34, %c0_35, %c0_36], %33 {strides = array<i32>} : memref<1x2x128xf32, #tpu.memory_space<vmem>>, vector<1x2x128xf32>,
    return
  }
  func.func @transform_0(%arg0: i32, %arg1: i32, %arg2: i32) -> (i32, i32, i32) {
    %c1_i32 = arith.constant 1 : i32
    %0 = arith.muli %arg0, %c1_i32 : i32
    %1 = arith.addi %0, %arg2 : i32
    %c0_i32 = arith.constant 0 : i32
    %c0_i32_0 = arith.constant 0 : i32
    return %arg1, %1, %c0_i32 : i32, i32, i32
  }
  func.func @transform_1(%arg0: i32, %arg1: i32, %arg2: i32) -> (i32, i32, i32) {
    %c1_i32 = arith.constant 1 : i32
    %0 = arith.muli %arg0, %c1_i32 : i32
    %1 = arith.addi %0, %arg2 : i32
    %c0_i32 = arith.constant 0 : i32
    %c0_i32_0 = arith.constant 0 : i32
    return %arg1, %1, %c0_i32 : i32, i32, i32
  }
  func.func @transform_2(%arg0: i32, %arg1: i32, %arg2: i32) -> (i32, i32, i32) {
    %c1_i32 = arith.constant 1 : i32
    %0 = arith.muli %arg0, %c1_i32 : i32
    %1 = arith.addi %0, %arg2 : i32
    %c0_i32 = arith.constant 0 : i32
    %c0_i32_0 = arith.constant 0 : i32
    return %arg1, %1, %c0_i32 : i32, i32, i32
  }
  func.func @transform_3(%arg0: i32, %arg1: i32, %arg2: i32) -> (i32, i32, i32) {
    %c1_i32 = arith.constant 1 : i32
    %0 = arith.muli %arg0, %c1_i32 : i32
    %1 = arith.addi %0, %arg1 : i32
    %c0_i32 = arith.constant 0 : i32
    %c0_i32_0 = arith.constant 0 : i32
    %c0_i32_1 = arith.constant 0 : i32
    return %1, %c0_i32, %c0_i32_0 : i32, i32, i32
  }
  func.func @transform_4(%arg0: i32, %arg1: i32, %arg2: i32) -> (i32, i32, i32) {
    %c1_i32 = arith.constant 1 : i32
    %0 = arith.muli %arg0, %c1_i32 : i32
    %1 = arith.addi %0, %arg1 : i32
    %c0_i32 = arith.constant 0 : i32
    %c0_i32_0 = arith.constant 0 : i32
    %c0_i32_1 = arith.constant 0 : i32
    return %1, %c0_i32, %c0_i32_0 : i32, i32, i32
  }
  func.func @transform_5(%arg0: i32, %arg1: i32, %arg2: i32) -> (i32, i32, i32) {
    %c1_i32 = arith.constant 1 : i32
    %0 = arith.muli %arg0, %c1_i32 : i32
    %1 = arith.addi %0, %arg1 : i32
    %c0_i32 = arith.constant 0 : i32
    %c0_i32_0 = arith.constant 0 : i32
    %c0_i32_1 = arith.constant 0 : i32
    return %1, %c0_i32, %c0_i32_0 : i32, i32, i32
  }
  func.func @transform_6(%arg0: i32, %arg1: i32, %arg2: i32) -> (i32, i32, i32) {
    %c1_i32 = arith.constant 1 : i32
    %0 = arith.muli %arg0, %c1_i32 : i32
    %1 = arith.addi %0, %arg1 : i32
    %c0_i32 = arith.constant 0 : i32
    %c0_i32_0 = arith.constant 0 : i32
    %c0_i32_1 = arith.constant 0 : i32
    return %1, %c0_i32, %c0_i32_0 : i32, i32, i32
  }
}

</mosaic_0001>

<bundles_post_ra>
// kernel: loss_fn.1
= control target key start
LH: loop header
LB: loop body
LE: loop exit
PB: predicated region body
PF: predicated region fallthrough
CT: control target
= control target key end

     0   :  { %v335_v0 = vmov 0.0   ;;  %vm154_vm0 = vcmask 1041409   ;;  %s426_s3 = inlined_call_operand.vmem [shape: f32[1,2,128], index: 3, kind: output, shape index: {0}]   ;;  %s427_s4 = inlined_call_operand.vmem [shape: f32[1,2,128], index: 4, kind: output, shape index: {1}]   ;;  %s428_s5 = inlined_call_operand.vmem [shape: f32[1,2,128], index: 5, kind: output, shape index: {2}]   ;;  %s429_s0 = inlined_call_operand.vmem [shape: f32[2,8,128], index: 0, kind: input, shape index: {}]   ;;  %s430_s1 = inlined_call_operand.vmem [shape: f32[2,8,128], index: 1, kind: input, shape index: {}]   ;;  %s431_s2 = inlined_call_operand.vmem [shape: bf16[2,8,128], index: 2, kind: input, shape index: {}]   ;;  %s432_s6 = inlined_call_operand.vmem [shape: f32[1,2,128], index: 6, kind: output, shape index: {3}]  }
   0x1   :  { %117 = vst [vmem:[%s426_s3] sm:$0x3] %v335_v0  ;;  %v121_v1 = vld [vmem:[%s429_s0] sm:$0xff]  ;;  %v122_v2 = vld [vmem:[%s429_s0 + $0x8] sm:$0xff] }
   0x2   :  { %v123_v3 = vld [vmem:[%s430_s1] sm:$0xff]  ;;  %118 = vst [vmem:[%s427_s4] sm:$0x3] %v335_v0  ;;  %v124_v4 = vld [vmem:[%s430_s1 + $0x8] sm:$0xff] }
   0x3   :  { %v129_v5 = vsub.f32 %v121_v1, %v123_v3  ;;  %v331_v6 = vld [vmem:[%s431_s2] sm:$0xff]   ;;  %v133_v7 = vsub.f32 1.0, %v123_v3  ;;  %119 = vst [vmem:[%s428_s5] sm:$0x3] %v335_v0  ;;  %v130_v8 = vsub.f32 %v122_v2, %v124_v4  ;;  %v134_v11 = vsub.f32 1.0, %v124_v4 }
   0x4   :  { %v332_v9 = vunpack.c.l.bf16 %v331_v6  ;;  %v333_v10 = vunpack.c.h.bf16 %v331_v6  ;;  %120 = vst [vmem:[%s432_s6] sm:$0x3] %v335_v0 }
   0x5   :  { %v131_v12 = vmul.f32 %v129_v5, %v129_v5  ;;  %v135_v13 = vsub.f32 %v133_v7, %v121_v1  ;;  %v132_v14 = vmul.f32 %v130_v8, %v130_v8  ;;  %v136_v15 = vsub.f32 %v134_v11, %v122_v2 }
   0x6   :  { %v202_v16 = vrot.slane %v332_v9, 4  ;;  %v208_v17 = vrot.slane %v333_v10, 4 }
   0x7   :  { %v140_v18 = vrot.slane %v131_v12, 4  ;;  %v160_v19 = vmul.f32 %v332_v9, %v131_v12  ;;  %v137_v20 = vmul.f32 %v135_v13, %v135_v13  ;;  %v146_v21 = vrot.slane %v132_v14, 4 }
   0x8   :  { %v161_v22 = vmul.f32 %v333_v10, %v132_v14  ;;  %v138_v23 = vmul.f32 %v136_v15, %v136_v15  ;;  %v203_v24 = vadd.f32 %v332_v9, %v202_v16  ;;  %v209_v28 = vadd.f32 %v333_v10, %v208_v17  ;;  %v139_v62 = vld [vmem:[%s426_s3] sm:$0x3] }
   0x9   :  { %v141_v25 = vadd.f32 %v140_v18, %v131_v12  ;;  %v162_v26 = vrot.slane %v160_v19, 4  ;;  %v181_v27 = vmul.f32 %v332_v9, %v137_v20  ;;  %v147_v29 = vadd.f32 %v146_v21, %v132_v14  ;;  %v159_v6 = vld [vmem:[%s427_s4] sm:$0x3] }
   0xa   :  { %v168_v30 = vrot.slane %v161_v22, 4  ;;  %v182_v31 = vmul.f32 %v333_v10, %v138_v23  ;;  %v204_v32 = vrot.slane %v203_v24, 2  ;;  %v210_v36 = vrot.slane %v209_v28, 2  ;;  %v180_v13 = vld [vmem:[%s428_s5] sm:$0x3] }
   0xb   :  { %v142_v33 = vrot.slane %v141_v25, 2  ;;  %v163_v34 = vadd.f32 %v162_v26, %v160_v19  ;;  %v183_v35 = vrot.slane %v181_v27, 4  ;;  %v148_v37 = vrot.slane %v147_v29, 2  ;;  %v201_v60 = vld [vmem:[%s432_s6] sm:$0x3] }
   0xc   :  { %v169_v38 = vadd.f32 %v168_v30, %v161_v22  ;;  %v189_v39 = vrot.slane %v182_v31, 4  ;;  %v205_v40 = vadd.f32 %v204_v32, %v203_v24  ;;  %v211_v44 = vadd.f32 %v210_v36, %v209_v28 }
   0xd   :  { %v143_v41 = vadd.f32 %v142_v33, %v141_v25  ;;  %v164_v42 = vrot.slane %v163_v34, 2  ;;  %v184_v43 = vadd.f32 %v183_v35, %v181_v27  ;;  %v149_v45 = vadd.f32 %v148_v37, %v147_v29 }
   0xe   :  { %v170_v46 = vrot.slane %v169_v38, 2  ;;  %v190_v47 = vadd.f32 %v189_v39, %v182_v31  ;;  %v206_v48 = vrot.slane %v205_v40, 1  ;;  %v212_v52 = vrot.slane %v211_v44, 1 }
   0xf   :  { %v144_v49 = vrot.slane %v143_v41, 1  ;;  %v165_v50 = vadd.f32 %v164_v42, %v163_v34  ;;  %v185_v51 = vrot.slane %v184_v43, 2  ;;  %v150_v53 = vrot.slane %v149_v45, 1 }
  0x10   :  { %v171_v54 = vadd.f32 %v170_v46, %v169_v38  ;;  %v191_v55 = vrot.slane %v190_v47, 2  ;;  %v207_v56 = vadd.f32 %v206_v48, %v205_v40  ;;  %v213_v61 = vadd.f32 %v212_v52, %v211_v44 }
  0x11   :  { %v145_v57 = vadd.f32 %v144_v49, %v143_v41  ;;  %v166_v58 = vrot.slane %v165_v50, 1  ;;  %v186_v59 = vadd.f32 %v185_v51, %v184_v43  ;;  %v151_v63 = vadd.f32 %v150_v53, %v149_v45 }
  0x12   :  { %v172_v0 = vrot.slane %v171_v54, 1  ;;  %v192_v1 = vadd.f32 %v191_v55, %v190_v47  ;;  %v216_v4 = vsel %vm154_vm0, %v213_v61, %v207_v56 }
  0x13   :  { %v167_v2 = vadd.f32 %v166_v58, %v165_v50  ;;  %v187_v3 = vrot.slane %v186_v59, 1  ;;  %v155_v5 = vsel %vm154_vm0, %v151_v63, %v145_v57  ;;  %v218_v9 = vadd.f32 %v216_v4, %v201_v60 }
  0x14   :  { %v173_v7 = vadd.f32 %v172_v0, %v171_v54  ;;  %v193_v8 = vrot.slane %v192_v1, 1  ;;  %v157_v10 = vadd.f32 %v155_v5, %v139_v62 }
  0x15   :  { %v188_v11 = vadd.f32 %v187_v3, %v186_v59  ;;  %219 = vst [vmem:[%s432_s6] sm:$0x3] %v218_v9 }
  0x16   :  { %v176_v12 = vsel %vm154_vm0, %v173_v7, %v167_v2  ;;  %v194_v14 = vadd.f32 %v193_v8, %v192_v1  ;;  %158 = vst [vmem:[%s426_s3] sm:$0x3] %v157_v10 }
  0x17   :  { %v178_v15 = vadd.f32 %v176_v12, %v159_v6 }
  0x18   :  { %v197_v16 = vsel %vm154_vm0, %v194_v14, %v188_v11 }
  0x19   :  { %179 = vst [vmem:[%s427_s4] sm:$0x3] %v178_v15  ;;  %v199_v17 = vadd.f32 %v197_v16, %v180_v13 }
  0x1b   :  { %200 = vst [vmem:[%s428_s5] sm:$0x3] %v199_v17 }

</bundles_post_ra>
